<compile_context>
chip_gen: v7x
topology: tpu7x:2x2x1
jax: 0.10.0
libtpu: 0.0.40
codegen_flags: <defaults>
</compile_context>

<pallas_src>
import functools

import jax
import jax.numpy as jnp
from jax import lax
from jax.experimental import pallas as pl
from jax.experimental.pallas import tpu as pltpu

ALPHA = 0.25
GAMMA = 2.0

_LANES = 128
_SUBLANES = 8
_CHUNK_TARGET = 512          # rows per in-kernel sub-chunk (~256 KiB f32 temps)
_SMALL_BYTES = 2 << 20       # inputs at/below this stay a single grid step
_MIN_STEPS = 4               # medium/large inputs get at least this many steps


def _device_kind() -> str:
    try:
        return jax.devices()[0].device_kind.lower()
    except Exception:  # defensive: no devices / backend not initialised yet
        return ""


def _pow_static(x, gamma):
    """x**gamma for a static Python gamma; small integer gamma -> repeated multiply."""
    if float(gamma).is_integer() and 0 <= int(gamma) <= 8:
        g = int(gamma)
        if g == 0:
            return jnp.ones_like(x)
        out = x
        for _ in range(g - 1):
            out = out * x
        return out
    return jnp.power(x, gamma)


def _pick_chunk(tm: int) -> int:
    """Largest multiple-of-8 divisor of tm that is <= _CHUNK_TARGET."""
    if tm <= _CHUNK_TARGET:
        return tm
    c = (_CHUNK_TARGET // _SUBLANES) * _SUBLANES
    while c > _SUBLANES:
        if tm % c == 0:
            return c
        c -= _SUBLANES
    return _SUBLANES


def _accumulate_block_bce(x_ref, t_ref, chunk: int, unroll: bool):
    """Sum of stable BCE-with-logits over the (tm, 128) block as a vreg-shaped
    (8, 128) f32 partial sum. Walks the block in `chunk`-row slices so the f32
    upcast / bce temporaries stay small (never tile-sized)."""
    tm = x_ref.shape[0]
    n_chunks = tm // chunk

    def one_chunk(j, acc):
        off = pl.multiple_of(j * chunk, chunk)
        x = x_ref[pl.ds(off, chunk), :].astype(jnp.float32)
        t = t_ref[pl.ds(off, chunk), :].astype(jnp.float32)
        # Numerically-stable BCE with logits (matches PyTorch):
        #   max(x, 0) - x*t + log(1 + exp(-|x|))
        bce = jnp.maximum(x, 0.0) - x * t + jnp.log1p(jnp.exp(-jnp.abs(x)))
        # Layout-preserving (chunk//8, 8, 128) regroup -> pure VPU adds.
        return acc + bce.reshape(chunk // _SUBLANES, _SUBLANES, _LANES).sum(axis=0)

    acc0 = jnp.zeros((_SUBLANES, _LANES), jnp.float32)
    if n_chunks == 1:
        return one_chunk(0, acc0)
    return lax.fori_loop(0, n_chunks, one_chunk, acc0, unroll=unroll)


def _focal_scalar_kernel(x_ref, t_ref, out_ref, acc_ref, *,
                         chunk, unroll, alpha, gamma, inv_n):
    """Single-TensorCore path: grid=(steps,), in-kernel scalar epilogue."""
    i = pl.program_id(0)

    @pl.when(i == 0)
    def _():
        acc_ref[...] = jnp.zeros_like(acc_ref)

    acc_ref[...] += _accumulate_block_bce(x_ref, t_ref, chunk, unroll)

    @pl.when(i == pl.num_programs(0) - 1)
    def _():
        # Single cross-lane/sublane reduce, done once, then the focal transform.
        mean_bce = jnp.sum(acc_ref[...], keepdims=True) * inv_n   # (1, 1)
        p = 1.0 - jnp.exp(-mean_bce)
        out_ref[...] = alpha * _pow_static(p, gamma) * mean_bce


def _focal_partial_kernel(x_ref, t_ref, psum_ref, acc_ref, *, chunk, unroll):
    """v7x path: grid=(num_blocks, steps) with a 'parallel' leading axis;
    writes a lane-dense (1, 8, 128) partial sum per block."""
    i = pl.program_id(1)

    @pl.when(i == 0)
    def _():
        acc_ref[...] = jnp.zeros_like(acc_ref)

    acc_ref[...] += _accumulate_block_bce(x_ref, t_ref, chunk, unroll)

    @pl.when(i == pl.num_programs(1) - 1)
    def _():
        psum_ref[0] = acc_ref[...]


def focal_loss(logits, targets, alpha=ALPHA, gamma=GAMMA):
    """Scalar binary focal loss over all elements (matches the PyTorch module).

    Accepts any shape, any floating logits dtype and floating/integer {0,1}
    targets dtype (narrower HBM dtypes just shrink DMA traffic; math is f32).
    """
    assert logits.shape == targets.shape, (logits.shape, targets.shape)
    assert jnp.issubdtype(logits.dtype, jnp.floating), logits.dtype
    n = int(logits.size)
    assert n > 0
    alpha = float(alpha)
    gamma = float(gamma)

    kind = _device_kind()
    is_v7x = "v7" in kind
    small_vmem = "v5" in kind            # v5e: 16 MiB scoped-VMEM default

    x1 = logits.reshape(-1)
    t1 = targets.reshape(-1)
    itembytes = x1.dtype.itemsize + t1.dtype.itemsize
    rows_raw = pl.cdiv(n, _LANES)

    num_blocks = 1
    if n * itembytes <= _SMALL_BYTES:
        # Genuinely small: whole (padded) slab as one tile, grid=(1,).
        tm = pl.cdiv(rows_raw, _SUBLANES) * _SUBLANES
        steps = 1
    else:
        # Big tiles to amortise the ~0.35us per-step cost, capped so that
        # 2 inputs x 2 pipeline buffers (+ chunk-sized temps) stay inside the
        # scoped-VMEM default (16 MiB on v5e, 32 MiB on v6e/v7x), but clamped
        # so the grid has at least _MIN_STEPS steps for pipelining.
        cap_rows = 4096 if small_vmem else 8192
        tm = max(_SUBLANES, min(cap_rows, rows_raw // _MIN_STEPS))
        if tm >= _CHUNK_TARGET:
            tm = (tm // _CHUNK_TARGET) * _CHUNK_TARGET
        else:
            tm = max(_SUBLANES, (tm // _SUBLANES) * _SUBLANES)
        steps = pl.cdiv(rows_raw, tm)
        if is_v7x and steps >= 8:
            # v7x has 2 TensorCores: shard the reduction over a leading
            # "parallel" axis; each block produces a lane-dense partial sum.
            num_blocks = 2
            steps = pl.cdiv(steps, num_blocks)

    chunk = _pick_chunk(tm)
    unroll = (tm // chunk) <= 32

    padded_rows = num_blocks * steps * tm
    padded_n = padded_rows * _LANES
    if padded_n != n:
        pad = padded_n - n
        # Pad logits with the most-negative finite value and targets with 0:
        #   max(x,0)=0, x*t=0, log1p(exp(-|x|))=0  ->  bce == 0 exactly,
        # so padding never perturbs the sum; we still divide by the true n.
        x1 = jnp.concatenate(
            [x1, jnp.full((pad,), jnp.finfo(x1.dtype).min, x1.dtype)])
        t1 = jnp.concatenate([t1, jnp.zeros((pad,), t1.dtype)])
    x2d = x1.reshape(padded_rows, _LANES)
    t2d = t1.reshape(padded_rows, _LANES)

    if num_blocks == 1:
        kernel = functools.partial(
            _focal_scalar_kernel, chunk=chunk, unroll=unroll,
            alpha=alpha, gamma=gamma, inv_n=1.0 / n)
        out = pl.pallas_call(
            kernel,
            out_shape=jax.ShapeDtypeStruct((1, 1), jnp.float32),
            grid_spec=pltpu.PrefetchScalarGridSpec(
                num_scalar_prefetch=0,
                grid=(steps,),
                in_specs=[
                    pl.BlockSpec((tm, _LANES), lambda i: (i, 0)),
                    pl.BlockSpec((tm, _LANES), lambda i: (i, 0)),
                ],
                out_specs=pl.BlockSpec((1, 1), lambda i: (0, 0)),
                scratch_shapes=[pltpu.VMEM((_SUBLANES, _LANES), jnp.float32)],
            ),
            compiler_params=pltpu.CompilerParams(
                dimension_semantics=("arbitrary",)),
        )(x2d, t2d)
        return out[0, 0]

    # v7x path: per-block partial sums from the kernel; tiny final reduce and
    # focal transform in the wrapper (a few scalar XLA ops).
    kernel = functools.partial(
        _focal_partial_kernel, chunk=chunk, unroll=unroll)
    psum = pl.pallas_call(
        kernel,
        out_shape=jax.ShapeDtypeStruct(
            (num_blocks, _SUBLANES, _LANES), jnp.float32),
        grid_spec=pltpu.PrefetchScalarGridSpec(
            num_scalar_prefetch=0,
            grid=(num_blocks, steps),
            in_specs=[
                pl.BlockSpec((tm, _LANES), lambda b, i: (b * steps + i, 0)),
                pl.BlockSpec((tm, _LANES), lambda b, i: (b * steps + i, 0)),
            ],
            out_specs=pl.BlockSpec((1, _SUBLANES, _LANES),
                                   lambda b, i: (b, 0, 0)),
            scratch_shapes=[pltpu.VMEM((_SUBLANES, _LANES), jnp.float32)],
        ),
        compiler_params=pltpu.CompilerParams(
            dimension_semantics=("parallel", "arbitrary")),
    )(x2d, t2d)
    mean_bce = jnp.sum(psum) * (1.0 / n)
    p = 1.0 - jnp.exp(-mean_bce)
    return alpha * _pow_static(p, gamma) * mean_bce


def focal_loss_ref(logits, targets, alpha=ALPHA, gamma=GAMMA):
    x = logits.astype(jnp.float32)
    t = targets.astype(jnp.float32)
    bce = jnp.mean(jnp.maximum(x, 0.0) - x * t + jnp.log1p(jnp.exp(-jnp.abs(x))))
    return alpha * (1.0 - jnp.exp(-bce)) ** gamma * bce


if __name__ == "__main__":
    key = jax.random.PRNGKey(0)
    k1, k2 = jax.random.split(key)
    # NCHW-shaped logits and {0,1} targets, same as the PyTorch module expects.
    x = jax.random.normal(k1, (2, 4, 16, 16), dtype=jnp.float32)
    t = (jax.random.uniform(k2, (2, 4, 16, 16)) > 0.5).astype(jnp.float32)

    loss = focal_loss(x, t)
    jax.block_until_ready(loss)

    ref = focal_loss_ref(x, t)
    assert jnp.allclose(loss, ref, rtol=1e-5, atol=1e-6), (loss, ref)
    print("KERNEL_OK")
</pallas_src>

<mosaic_0001>
module attributes {stable_mosaic.version = 11 : i64} {
  func.func @_focal_scalar_kernel(%arg0: i32, %arg1: memref<16x128xf32, #tpu.memory_space<vmem>>, %arg2: memref<16x128xf32, #tpu.memory_space<vmem>>, %arg3: memref<1x1xf32, #tpu.memory_space<vmem>>, %arg4: memref<8x128xf32, #tpu.memory_space<vmem>>) attributes {dimension_semantics = [#tpu.dimension_semantics<arbitrary>], iteration_bounds = array<i64: 1>, scalar_prefetch = 0 : i64, scratch_operands = 1 : i64, tpu.core_type = #tpu.core_type<tc>, window_params = [{transform_indices = @transform_0, window_bounds = array<i64: 16, 128>}, {transform_indices = @transform_1, window_bounds = array<i64: 16, 128>}, {pipeline_mode = #tpu.pipeline_mode<synchronous>, transform_indices = @transform_2, window_bounds = array<i64: 1, 1>}]} {
    %c0_i32 = arith.constant 0 : i32
    %0 = arith.cmpi eq, %arg0, %c0_i32 : i32
    %1 = arith.extui %0 : i1 to i32
    %c0_i32_0 = arith.constant 0 : i32
    %2 = arith.cmpi ne, %1, %c0_i32_0 : i32
    scf.if %2 {
      %cst_12 = arith.constant 0.000000e+00 : f32
      %28 = vector.broadcast %cst_12 : f32 to vector<8x128xf32>
      %c0_13 = arith.constant 0 : index
      %c0_14 = arith.constant 0 : index
      %29 = vector.load %arg4[%c0_13, %c0_14] : memref<8x128xf32, #tpu.memory_space<vmem>>, vector<8x128xf32>
      tpu.vector_store %arg4[%c0_13, %c0_14], %28 {strides = array<i32>} : memref<8x128xf32, #tpu.memory_space<vmem>>, vector<8x128xf32>,
    } else {
    }
    %c0 = arith.constant 0 : index
    %c0_1 = arith.constant 0 : index
    %3 = vector.load %arg4[%c0, %c0_1] : memref<8x128xf32, #tpu.memory_space<vmem>>, vector<8x128xf32>
    %cst = arith.constant 0.000000e+00 : f32
    %4 = vector.broadcast %cst : f32 to vector<8x128xf32>
    %c0_i32_2 = arith.constant 0 : i32
    %5 = tpu.assume_multiple %c0_i32_2, 16 : i32
    %6 = arith.index_cast %5 : i32 to index
    %c0_3 = arith.constant 0 : index
    %7 = vector.load %arg1[%6, %c0_3] : memref<16x128xf32, #tpu.memory_space<vmem>>, vector<16x128xf32>
    %8 = arith.index_cast %5 : i32 to index
    %c0_4 = arith.constant 0 : index
    %9 = vector.load %arg2[%8, %c0_4] : memref<16x128xf32, #tpu.memory_space<vmem>>, vector<16x128xf32>
    %cst_5 = arith.constant 0.000000e+00 : f32
    %10 = vector.broadcast %cst_5 : f32 to vector<16x128xf32>
    %11 = arith.maximumf %7, %10 : vector<16x128xf32>
    %12 = arith.mulf %7, %9 : vector<16x128xf32>
    %13 = arith.subf %11, %12 : vector<16x128xf32>
    %14 = math.absf %7 : vector<16x128xf32>
    %cst_6 = arith.constant 0.000000e+00 : f32
    %15 = vector.broadcast %cst_6 : f32 to vector<16x128xf32>
    %16 = arith.subf %15, %14 : vector<16x128xf32>
    %17 = math.exp %16 : vector<16x128xf32>
    %18 = math.log1p %17 : vector<16x128xf32>
    %19 = arith.addf %13, %18 : vector<16x128xf32>
    %20 = vector.shape_cast %19 : vector<16x128xf32> to vector<2x8x128xf32>
    %cst_7 = arith.constant dense<0.000000e+00> : vector<8x128xf32>
    %21 = vector.multi_reduction <add>, %20, %cst_7 [0] : vector<2x8x128xf32> to vector<8x128xf32>
    %22 = arith.addf %4, %21 : vector<8x128xf32>
    %23 = arith.addf %3, %22 : vector<8x128xf32>
    %c0_8 = arith.constant 0 : index
    %c0_9 = arith.constant 0 : index
    %24 = vector.load %arg4[%c0_8, %c0_9] : memref<8x128xf32, #tpu.memory_space<vmem>>, vector<8x128xf32>
    tpu.vector_store %arg4[%c0_8, %c0_9], %23 {strides = array<i32>} : memref<8x128xf32, #tpu.memory_space<vmem>>, vector<8x128xf32>,
    %c0_i32_10 = arith.constant 0 : i32
    %25 = arith.cmpi eq, %arg0, %c0_i32_10 : i32
    %26 = arith.extui %25 : i1 to i32
    %c0_i32_11 = arith.constant 0 : i32
    %27 = arith.cmpi ne, %26, %c0_i32_11 : i32
    scf.if %27 {
      %c0_12 = arith.constant 0 : index
      %c0_13 = arith.constant 0 : index
      %28 = vector.load %arg4[%c0_12, %c0_13] : memref<8x128xf32, #tpu.memory_space<vmem>>, vector<8x128xf32>
      %29 = vector.shape_cast %28 : vector<8x128xf32> to vector<1x8x128xf32>
      %cst_14 = arith.constant dense<0.000000e+00> : vector<1xf32>
      %30 = vector.multi_reduction <add>, %29, %cst_14 [1, 2] : vector<1x8x128xf32> to vector<1xf32>
      %31 = vector.shape_cast %30 : vector<1xf32> to vector<1x1x1xf32>
      %32 = vector.extract %31[0, 0, 0] : f32 from vector<1x1x1xf32>
      %33 = vector.broadcast %32 : f32 to vector<1x1xf32>
      %cst_15 = arith.constant 4.8828125E-4 : f32
      %34 = vector.broadcast %cst_15 : f32 to vector<1x1xf32>
      %35 = arith.mulf %33, %34 : vector<1x1xf32>
      %cst_16 = arith.constant 0.000000e+00 : f32
      %36 = vector.broadcast %cst_16 : f32 to vector<1x1xf32>
      %37 = arith.subf %36, %35 : vector<1x1xf32>
      %38 = math.exp %37 : vector<1x1xf32>
      %cst_17 = arith.constant 1.000000e+00 : f32
      %39 = vector.broadcast %cst_17 : f32 to vector<1x1xf32>
      %40 = arith.subf %39, %38 : vector<1x1xf32>
      %41 = arith.mulf %40, %40 : vector<1x1xf32>
      %cst_18 = arith.constant 2.500000e-01 : f32
      %42 = vector.broadcast %cst_18 : f32 to vector<1x1xf32>
      %43 = arith.mulf %42, %41 : vector<1x1xf32>
      %44 = arith.mulf %43, %35 : vector<1x1xf32>
      %c0_19 = arith.constant 0 : index
      %c0_20 = arith.constant 0 : index
      %45 = vector.load %arg3[%c0_19, %c0_20] : memref<1x1xf32, #tpu.memory_space<vmem>>, vector<1x1xf32>
      tpu.vector_store %arg3[%c0_19, %c0_20], %44 {strides = array<i32>} : memref<1x1xf32, #tpu.memory_space<vmem>>, vector<1x1xf32>,
    } else {
    }
    return
  }
  func.func @transform_0(%arg0: i32) -> (i32, i32) {
    %c0_i32 = arith.constant 0 : i32
    %c0_i32_0 = arith.constant 0 : i32
    return %arg0, %c0_i32 : i32, i32
  }
  func.func @transform_1(%arg0: i32) -> (i32, i32) {
    %c0_i32 = arith.constant 0 : i32
    %c0_i32_0 = arith.constant 0 : i32
    return %arg0, %c0_i32 : i32, i32
  }
  func.func @transform_2(%arg0: i32) -> (i32, i32) {
    %c0_i32 = arith.constant 0 : i32
    %c0_i32_0 = arith.constant 0 : i32
    %c0_i32_1 = arith.constant 0 : i32
    return %c0_i32, %c0_i32_0 : i32, i32
  }
}

</mosaic_0001>

<bundles_post_ra>
// kernel: tpu_custom_call.1
= control target key start
LH: loop header
LB: loop body
LE: loop exit
PB: predicated region body
PF: predicated region fallthrough
CT: control target
= control target key end

     0   :  { %7 = vsyncpa [#allocation4], 0  ;;  %s273_s0 = inlined_call_operand.hbm [shape: f32[16,128], index: 0, kind: input, shape index: {}]   ;;  %s274_s1 = inlined_call_operand.hbm [shape: f32[16,128], index: 1, kind: input, shape index: {}]   ;;  %s275_s2 = inlined_call_operand.hbm [shape: f32[1,1], index: 2, kind: output, shape index: {}]  }
   0x1   :  { %8 = vsyncpa [#allocation7], 0 }
   0x2   :  { %9 = vsyncpa [#allocation5], 0  ;;  %s217_s9 = smov [#allocation3]   ;;  %s145_s13 = scalar_lea.hbm %s273_s0, 256 }
   0x3   :  { %s15_s10 = sshll.u32 %s217_s9, 4  ;;  %p146_p0 = scmp.ne.s32.totalorder %s273_s0, %s145_s13  ;;  %s16_s10 = int_to_ptr.vmem [resolvable:$true] %s15_s10 }
   0x4   :  { %p149_p1 = scmp.lt.u32.totalorder %s145_s13, %s273_s0 }
   0x6   :  { %p151_p2 = pnand %p149_p1, %p146_p0 }
   0x8   :  { %154 = shalt.err (!%p151_p2)
}
   0x9   :  { %s155_s18 = scalar_lea.vmem %s16_s10, 256  ;;  %p160_p4 = scmp.lt.s32.totalorder %s16_s10, %s16_s10 }
   0xa   :  { %p156_p3 = scmp.ne.s32.totalorder %s16_s10, %s155_s18  ;;  %p161_p5 = scmp.lt.s32.totalorder %s155_s18, %s155_s18 }
   0xc   :  { %p162_p6 = por %p161_p5, %p160_p4 }
   0xe   :  { %p163_p7 = pnand %p162_p6, %p156_p3 }
  0x10   :  { %166 = shalt.err (!%p163_p7)
}
  0x11   :  { %s218_s19 = smov 128   ;;  %s219_s20 = smov 8  }
  0x12   :  { %21 = dma.hbm_to_vmem [thread:$0]  %s273_s0, 256, %s16_s10, [#allocation4], %s218_s19, %s218_s19, %s219_s20  }
  0x13   :  { %s220_s23 = smov [#allocation6]   ;;  %s167_s27 = scalar_lea.hbm %s274_s1, 256 }
  0x14   :  { %s27_s24 = sshll.u32 %s220_s23, 4  ;;  %p168_p8 = scmp.ne.s32.totalorder %s274_s1, %s167_s27  ;;  %s28_s24 = int_to_ptr.vmem [resolvable:$true] %s27_s24 }
  0x15   :  { %p171_p9 = scmp.lt.u32.totalorder %s167_s27, %s274_s1 }
  0x17   :  { %p173_p10 = pnand %p171_p9, %p168_p8 }
  0x19   :  { %176 = shalt.err (!%p173_p10)
}
  0x1a   :  { %s177_s4 = scalar_lea.vmem %s28_s24, 256  ;;  %p182_p12 = scmp.lt.s32.totalorder %s28_s24, %s28_s24 }
  0x1b   :  { %p178_p11 = scmp.ne.s32.totalorder %s28_s24, %s177_s4  ;;  %p183_p13 = scmp.lt.s32.totalorder %s177_s4, %s177_s4 }
  0x1d   :  { %p184_p0 = por %p183_p13, %p182_p12 }
  0x1f   :  { %p185_p1 = pnand %p184_p0, %p178_p11 }
  0x21   :  { %188 = shalt.err (!%p185_p1)
}
  0x22   :  { %33 = dma.hbm_to_vmem [thread:$0]  %s274_s1, 256, %s28_s24, [#allocation7], %s218_s19, %s218_s19, %s219_s20  }
  0x23   :  { %211 = dma.done.wait [#allocation4], 256  }
  0x24   :  { %212 = vsyncadd [#allocation4], 4294967040 }
  0x25   :  { %213 = dma.done.wait [#allocation7], 256  }
  0x26   :  { %214 = vsyncadd [#allocation7], 4294967040  ;;  %v46_v0 = vld [vmem:[#allocation3] sm:$0xff]  ;;  %v47_v1 = vld [vmem:[#allocation3 + $0x8] sm:$0xff]  ;;  %s221_s6 = smov [#allocation8]   ;;  %vm110_vm2 = vcmask 0  }
  0x27   :  { %v56_v2 = vand.u32 2147483647, %v46_v0  ;;  %v57_v3 = vand.u32 2147483647, %v47_v1  ;;  %v48_v14 = vld [vmem:[#allocation6] sm:$0xff]  ;;  %v49_v15 = vld [vmem:[#allocation6 + $0x8] sm:$0xff] }
  0x28   :  { %v50_v17 = vmax.f32 %v46_v0, 0.0  ;;  %v52_v18 = vmul.f32 %v48_v14, %v46_v0  ;;  %v51_v21 = vmax.f32 %v47_v1, 0.0  ;;  %v53_v22 = vmul.f32 %v49_v15, %v47_v1  ;;  %s118_s7 = sshll.u32 %s221_s6, 4  ;;  %s119_s7 = int_to_ptr.vmem [resolvable:$true] %s118_s7 }
  0x29   :  { %v58_v4 = vsub.f32 0.0, %v56_v2  ;;  %v59_v5 = vsub.f32 0.0, %v57_v3  ;;  %s189_s8 = scalar_lea.vmem %s119_s7, 16  ;;  %s193_s9 = scalar_lea.vmem %s119_s7, 32 }
  0x2a   :  { %v54_v26 = vsub.f32 %v50_v17, %v52_v18  ;;  %v55_v29 = vsub.f32 %v51_v21, %v53_v22  ;;  %p190_p2 = scmp.ne.s32.totalorder %s119_s7, %s189_s8  ;;  %p194_p3 = scmp.lt.s32.totalorder %s119_s7, %s119_s7 }
  0x2b   :  { %v60_v6 = vmul.f32 1.442695, %v58_v4  ;;  %v62_v7 = vmul.f32 1.442695, %v59_v5  ;;  %p195_p4 = scmp.lt.s32.totalorder %s193_s9, %s189_s8 }
  0x2d   :  { %135 = vpow2.f32 %v60_v6  ;;  %p196_p5 = por %p195_p4, %p194_p3 }
  0x2e   :  { %137 = vpow2.f32 %v62_v7 }
  0x2f   :  { %p197_p6 = pnand %p196_p5, %p190_p2 }
  0x37   :  { %v136_v8 = vpop.eup %135 }
  0x38   :  { %v138_v9 = vpop.eup %137  ;;  %v64_v10 = vadd.f32 1.0, %v136_v8  ;;  %v67_v12 = vmul.f32 -0.5, %v136_v8  ;;  %v70_v19 = vand.u32 2147483647, %v136_v8 }
  0x39   :  { %v73_v11 = vadd.f32 1.0, %v138_v9  ;;  %v76_v13 = vmul.f32 -0.5, %v138_v9  ;;  %v79_v23 = vand.u32 2147483647, %v138_v9 }
  0x3a   :  { %139 = vlog2.f32 %v64_v10  ;;  %v68_v16 = vadd.f32 1.0, %v67_v12  ;;  %vm71_vm0 = vcmp.lt.f32.partialorder %v70_v19, 0.0004427343 }
  0x3b   :  { %141 = vlog2.f32 %v73_v11  ;;  %v77_v20 = vadd.f32 1.0, %v76_v13  ;;  %vm80_vm1 = vcmp.lt.f32.partialorder %v79_v23, 0.0004427343 }
  0x3c   :  { %v69_v24 = vmul.f32 %v136_v8, %v68_v16 }
  0x3d   :  { %v78_v27 = vmul.f32 %v138_v9, %v77_v20 }
  0x44   :  { %v140_v25 = vpop.eup %139 }
  0x45   :  { %v142_v28 = vpop.eup %141  ;;  %v66_v30 = vmul.f32 0.6931472, %v140_v25 }
  0x46   :  { %v75_v31 = vmul.f32 0.6931472, %v142_v28 }
  0x47   :  { %v72_v32 = vsel %vm71_vm0, %v69_v24, %v66_v30 }
  0x48   :  { %v81_v33 = vsel %vm80_vm1, %v78_v27, %v75_v31  ;;  %v82_v34 = vadd.f32 %v72_v32, %v54_v26 }
  0x49   :  { %v83_v35 = vadd.f32 %v81_v33, %v55_v29 }
  0x4b   :  { %v84_v36 = vadd.f32 %v83_v35, %v82_v34 }
  0x4d   :  { %92 = vadd.xlane.f32.xlu0 %v84_v36 }
  0xda   :  { %v93_v37 = vpop.xlane.xlu0 %92 }
  0xdb   :  { %v94_v38 = vrot.slane %v93_v37, 4 }
  0xdd   :  { %v95_v39 = vadd.f32 %v94_v38, %v93_v37 }
  0xdf   :  { %v96_v40 = vrot.slane %v95_v39, 2 }
  0xe1   :  { %v97_v41 = vadd.f32 %v96_v40, %v95_v39 }
  0xe3   :  { %v98_v42 = vrot.slane %v97_v41, 1 }
  0xe5   :  { %v99_v43 = vadd.f32 %v98_v42, %v97_v41 }
  0xe7   :  { %128 = vpush %v99_v43 }
 0x118   :  { %s129_s1 = spop %128 }
 0x119   :  { %v101_v44 = vstv %s129_s1 }
 0x11a   :  { %v102_v45 = vmul.f32 0.00048828125, %v101_v44 }
 0x11c   :  { %v103_v46 = vsub.f32 0.0, %v102_v45 }
 0x11e   :  { %v104_v47 = vmul.f32 1.442695, %v103_v46 }
 0x120   :  { %143 = vpow2.f32 %v104_v47 }
 0x12a   :  { %v144_v48 = vpop.eup %143 }
 0x12b   :  { %v106_v49 = vsub.f32 1.0, %v144_v48 }
 0x12d   :  { %v107_v50 = vmul.f32 %v106_v49, %v106_v49 }
 0x12f   :  { %v108_v51 = vmul.f32 0.25, %v107_v50 }
 0x131   :  { %v109_v52 = vmul.f32 %v108_v51, %v102_v45 }
 0x133   :  { %111 = vst.msk [vmem:[#allocation8] sm:$0x1] %vm110_vm2, %v109_v52 }
 0x134   :  { %200 = shalt.err (!%p197_p6)
}
 0x135   :  { %s201_s12 = scalar_lea.hbm %s275_s2, 16 }
 0x136   :  { %p202_p7 = scmp.ne.s32.totalorder %s275_s2, %s201_s12  ;;  %p205_p8 = scmp.lt.u32.totalorder %s201_s12, %s275_s2 }
 0x138   :  { %p207_p9 = pnand %p205_p8, %p202_p7 }
 0x13a   :  { %210 = shalt.err (!%p207_p9)
}
 0x13b   :  { %121 = dma.vmem_to_hbm [thread:$0]  %s119_s7, 16, %s275_s2, [#allocation5]  }
 0x13c   :  { %215 = dma.done.wait [#allocation5], 16  }
 0x13d   :  { %216 = vsyncadd [#allocation5], 4294967280 }
 0x13e   :  { %125 = vsyncpa [#allocation4], 1 }
 0x13f   :  { %126 = vsyncpa [#allocation7], 1 }
 0x140   :  { %127 = vsyncpa [#allocation5], 1 }

</bundles_post_ra>
